<compile_context>
chip_gen: v6e
topology: v6e:2x2x1
jax: 0.10.0
libtpu: 0.0.40
codegen_flags: <defaults>
</compile_context>

<pallas_src>
import jax
import jax.numpy as jnp
import numpy as np
from jax.experimental import pallas as pl
from jax.experimental.pallas import tpu as pltpu


def _round_up(x, m):
    return ((x + m - 1) // m) * m


# ---------------------------------------------------------------------------
# Kernel: one MXU matmul + f32 bias epilogue.
# ---------------------------------------------------------------------------
def fused_pooling_kernel(x_ref, w_ref, b_ref, o_ref):
    # x_ref: (tb, K)   w_ref: (K, O)   b_ref: (1, O) f32   o_ref: (tb, O)
    x = x_ref[...].astype(w_ref.dtype)          # in-kernel cast: no separate XLA cast pass
    acc = jnp.dot(x, w_ref[...], preferred_element_type=jnp.float32)
    o_ref[...] = (acc + b_ref[...]).astype(o_ref.dtype)


# ---------------------------------------------------------------------------
# One-time weight preprocessing (outside the hot path).
# ---------------------------------------------------------------------------
def make_fused_params(conv_w, conv_b, lin_w, lin_b, n_channels, n_time_steps,
                      compute_dtype=jnp.bfloat16):
    """Fold conv(1x1) + flatten + linear into a single (C*T, O) weight and (1, O) bias."""
    C, T = n_channels, n_time_steps
    P = conv_w.shape[0]
    O = lin_w.shape[0]

    wc = conv_w.reshape(P, C).astype(jnp.float32)           # (P, C)
    lw3 = lin_w.reshape(O, P, T).astype(jnp.float32)        # (O, P, T): linear col p*T+t
    # W_f[c*T + t, o] = sum_p wc[p, c] * lin_w[o, p*T + t]
    w_f = jnp.einsum("pc,opt->cto", wc, lw3).reshape(C * T, O).astype(compute_dtype)
    b_f = (jnp.einsum("p,opt->o", conv_b.astype(jnp.float32), lw3)
           + lin_b.astype(jnp.float32)).reshape(1, O)        # keep bias in f32
    return w_f, b_f


# ---------------------------------------------------------------------------
# Wrapper: batch-tiled pallas_call.
# ---------------------------------------------------------------------------
def simple_pooling(x, w_f, b_f, *, out_dtype=jnp.float32, batch_tile=8192):
    """x: (B, C, T) NCT.  w_f: (C*T, O).  b_f: (1, O) f32.  Returns (B, O) in out_dtype."""
    B, C, T = x.shape
    K = C * T
    O = w_f.shape[1]
    assert w_f.shape[0] == K, "fused weight / input shape mismatch"

    # Contiguous (B, C, T) -> (B, K): metadata-only reshape, no extra HBM pass.
    # c-major / t-minor ordering matches the fused-weight row ordering (torch Flatten).
    x2 = x.reshape(B, K)

    x_itemsize = jnp.dtype(x.dtype).itemsize
    out_itemsize = jnp.dtype(out_dtype).itemsize

    # --- batch tile selection ------------------------------------------------
    if B < 8:
        tb = B                                   # block == full array on the sublane axis
    else:
        tb = min(batch_tile, _round_up(B, 8))
        # v7x has 2 TensorCores: keep >= 2 "parallel" grid steps on large batches.
        if pl.cdiv(B, tb) < 2 and B >= 2048:
            tb = _round_up(pl.cdiv(B, 2), 8)
        # Keep the double-buffered in+out footprint within a conservative VMEM budget
        # (safe on v7x's smaller 64 MiB physical / ~32 MiB scoped VMEM as well).
        budget = 24 * 1024 * 1024
        per_row = 2 * (K * x_itemsize + O * out_itemsize)
        max_tb = max(8, (budget // per_row) // 8 * 8)
        tb = min(tb, max_tb)

    grid = (pl.cdiv(B, tb),)                     # ragged tail handled by Pallas block clipping

    cost = pl.CostEstimate(
        flops=2 * B * K * O,
        transcendentals=0,
        bytes_accessed=(B * K * x_itemsize                        # activations (read once)
                        + K * O * jnp.dtype(w_f.dtype).itemsize   # fused weight (VMEM-resident)
                        + O * 4                                    # fused bias
                        + B * O * out_itemsize),                   # unpadded output
    )

    out = pl.pallas_call(
        fused_pooling_kernel,
        out_shape=jax.ShapeDtypeStruct((B, O), out_dtype),
        grid=grid,
        in_specs=[
            pl.BlockSpec((tb, K), lambda i: (i, 0)),       # batch-tiled activations
            pl.BlockSpec((K, O), lambda i: (0, 0)),        # fused weight: VMEM-resident
            pl.BlockSpec((1, O), lambda i: (0, 0)),        # fused bias:   VMEM-resident
        ],
        out_specs=pl.BlockSpec((tb, O), lambda i: (i, 0)),  # unpadded, no wrapper slice
        compiler_params=pltpu.CompilerParams(
            dimension_semantics=("parallel",),              # batch axis -> megacore
            vmem_limit_bytes=32 * 1024 * 1024,
        ),
        cost_estimate=cost,
    )(x2, w_f, b_f)

    return out


# ---------------------------------------------------------------------------
# Pure-JAX reference matching the PyTorch module (f32, unfused).
# ---------------------------------------------------------------------------
def simple_pooling_ref(x, conv_w, conv_b, lin_w, lin_b):
    wc = conv_w.reshape(conv_w.shape[0], x.shape[1])
    conv = jnp.einsum("pc,bct->bpt", wc, x) + conv_b[None, :, None]
    flat = conv.reshape(x.shape[0], -1)
    return flat @ lin_w.T + lin_b[None, :]


if __name__ == "__main__":
    # Module hyperparameters (small, consistent with forward()).
    batch = 2
    n_hidden_channels = 8
    n_time_steps = 16            # K = C*T = 128 (MXU-aligned)
    pooling_channels = 4
    out_dim = 32

    key = jax.random.PRNGKey(0)
    kx, kcw, kcb, klw, klb, kx2 = jax.random.split(key, 6)

    x = jax.random.normal(kx, (batch, n_hidden_channels, n_time_steps), jnp.float32)
    conv_w = jax.random.normal(kcw, (pooling_channels, n_hidden_channels, 1), jnp.float32) * 0.1
    conv_b = jax.random.normal(kcb, (pooling_channels,), jnp.float32) * 0.1
    lin_w = jax.random.normal(klw, (out_dim, n_time_steps * pooling_channels), jnp.float32) * 0.1
    lin_b = jax.random.normal(klb, (out_dim,), jnp.float32) * 0.1

    ref = simple_pooling_ref(x, conv_w, conv_b, lin_w, lin_b)

    # 1) f32 path: fused kernel must match the unfused reference tightly.
    wf32, bf32 = make_fused_params(conv_w, conv_b, lin_w, lin_b,
                                   n_hidden_channels, n_time_steps,
                                   compute_dtype=jnp.float32)
    out_f32 = jax.block_until_ready(simple_pooling(x, wf32, bf32, out_dtype=jnp.float32))
    assert out_f32.shape == (batch, out_dim)
    np.testing.assert_allclose(np.asarray(out_f32), np.asarray(ref), rtol=1e-5, atol=1e-5)

    # 2) Production path: bf16 fused weight + bf16 output, f32 activations cast in-kernel.
    wbf, bbf = make_fused_params(conv_w, conv_b, lin_w, lin_b,
                                 n_hidden_channels, n_time_steps,
                                 compute_dtype=jnp.bfloat16)
    out_bf16 = jax.block_until_ready(simple_pooling(x, wbf, bbf, out_dtype=jnp.bfloat16))
    assert out_bf16.shape == (batch, out_dim)
    np.testing.assert_allclose(np.asarray(out_bf16, dtype=np.float32), np.asarray(ref),
                               rtol=2e-2, atol=2e-2)

    # 3) Multi-step grid + ragged batch tail (no jnp.pad): B=20 with an 8-row tile -> grid=3,
    #    last block clipped by Pallas.
    x_big = jax.random.normal(kx2, (20, n_hidden_channels, n_time_steps), jnp.float32)
    ref_big = simple_pooling_ref(x_big, conv_w, conv_b, lin_w, lin_b)
    out_big = jax.block_until_ready(
        simple_pooling(x_big, wf32, bf32, out_dtype=jnp.float32, batch_tile=8))
    assert out_big.shape == (20, out_dim)
    np.testing.assert_allclose(np.asarray(out_big), np.asarray(ref_big), rtol=1e-5, atol=1e-5)

    print("KERNEL_OK")
</pallas_src>

<mosaic_0001>
module attributes {stable_mosaic.version = 11 : i64} {
  func.func @fused_pooling_kernel(%arg0: i32, %arg1: memref<2x128xf32, #tpu.memory_space<vmem>>, %arg2: memref<128x32xf32, #tpu.memory_space<vmem>>, %arg3: memref<1x32xf32, #tpu.memory_space<vmem>>, %arg4: memref<2x32xf32, #tpu.memory_space<vmem>>) attributes {dimension_semantics = [#tpu.dimension_semantics<parallel>], iteration_bounds = array<i64: 1>, scalar_prefetch = 0 : i64, scratch_operands = 0 : i64, tpu.core_type = #tpu.core_type<tc>, window_params = [{transform_indices = @transform_0, window_bounds = array<i64: 2, 128>}, {pipeline_mode = #tpu.pipeline_mode<synchronous>, transform_indices = @transform_1, window_bounds = array<i64: 128, 32>}, {pipeline_mode = #tpu.pipeline_mode<synchronous>, transform_indices = @transform_2, window_bounds = array<i64: 1, 32>}, {transform_indices = @transform_3, window_bounds = array<i64: 2, 32>}]} {
    %c0 = arith.constant 0 : index
    %c0_0 = arith.constant 0 : index
    %0 = vector.load %arg1[%c0, %c0_0] : memref<2x128xf32, #tpu.memory_space<vmem>>, vector<2x128xf32>
    %c0_1 = arith.constant 0 : index
    %c0_2 = arith.constant 0 : index
    %1 = vector.load %arg2[%c0_1, %c0_2] : memref<128x32xf32, #tpu.memory_space<vmem>>, vector<128x32xf32>
    %cst = arith.constant dense<0.000000e+00> : vector<2x32xf32>
    %2 = tpu.matmul %0, %1, %cst {dimension_numbers = #tpu.dot_dimension_numbers<[1], [0], [0], [1], [0, 0, 1, 1], [], []>} : vector<2x128xf32>, vector<128x32xf32>, vector<2x32xf32> -> vector<2x32xf32>
    %c0_3 = arith.constant 0 : index
    %c0_4 = arith.constant 0 : index
    %3 = vector.load %arg3[%c0_3, %c0_4] : memref<1x32xf32, #tpu.memory_space<vmem>>, vector<1x32xf32>
    %4 = vector.broadcast %3 : vector<1x32xf32> to vector<2x32xf32>
    %5 = arith.addf %2, %4 : vector<2x32xf32>
    %c0_5 = arith.constant 0 : index
    %c0_6 = arith.constant 0 : index
    %6 = vector.load %arg4[%c0_5, %c0_6] : memref<2x32xf32, #tpu.memory_space<vmem>>, vector<2x32xf32>
    tpu.vector_store %arg4[%c0_5, %c0_6], %5 {strides = array<i32>} : memref<2x32xf32, #tpu.memory_space<vmem>>, vector<2x32xf32>,
    return
  }
  func.func @transform_0(%arg0: i32) -> (i32, i32) {
    %c0_i32 = arith.constant 0 : i32
    %c0_i32_0 = arith.constant 0 : i32
    return %arg0, %c0_i32 : i32, i32
  }
  func.func @transform_1(%arg0: i32) -> (i32, i32) {
    %c0_i32 = arith.constant 0 : i32
    %c0_i32_0 = arith.constant 0 : i32
    %c0_i32_1 = arith.constant 0 : i32
    return %c0_i32, %c0_i32_0 : i32, i32
  }
  func.func @transform_2(%arg0: i32) -> (i32, i32) {
    %c0_i32 = arith.constant 0 : i32
    %c0_i32_0 = arith.constant 0 : i32
    %c0_i32_1 = arith.constant 0 : i32
    return %c0_i32, %c0_i32_0 : i32, i32
  }
  func.func @transform_3(%arg0: i32) -> (i32, i32) {
    %c0_i32 = arith.constant 0 : i32
    %c0_i32_0 = arith.constant 0 : i32
    return %arg0, %c0_i32 : i32, i32
  }
}

</mosaic_0001>

<bundles_post_ra>
// kernel: tpu_custom_call.1
= control target key start
LH: loop header
LB: loop body
LE: loop exit
PB: predicated region body
PF: predicated region fallthrough
CT: control target
= control target key end

     0   :  { %v203_v1 = vmov 0.0   ;;  %vm204_vm0 = vmmov 0   ;;  %s283_s0 = inlined_call_operand.vmem [shape: f32[2,128], index: 0, kind: input, shape index: {}]   ;;  %s284_s1 = inlined_call_operand.vmem [shape: f32[128,32], index: 1, kind: input, shape index: {}]   ;;  %s285_s2 = inlined_call_operand.vmem [shape: f32[1,32], index: 2, kind: input, shape index: {}]   ;;  %s286_s3 = inlined_call_operand.hbm [shape: f32[2,32], index: 3, kind: output, shape index: {}]  }
   0x1   :  { %v31_v0 = vld [vmem:[%s284_s1 + $0x78] sm:$0xff]  ;;  %143 = vmatprep.subr.mxu0 %v203_v1  ;;  %v30_v2 = vld [vmem:[%s284_s1 + $0x70] sm:$0xff]  ;;  %175 = vmatprep.mubr.msk.f32.mxu0 %vm204_vm0, %v203_v1  ;;  %v29_v3 = vld [vmem:[%s284_s1 + $0x68] sm:$0xff] }
   0x2   :  { %144 = vmatpush3.msra.mxu0 %v31_v0  ;;  %v28_v4 = vld [vmem:[%s284_s1 + $0x60] sm:$0xff] }
   0x3   :  { %145 = vmatprep.subr.mxu0 %v203_v1 }
   0x4   :  { %146 = vmatpush3.msra.mxu0 %v30_v2 }
   0x5   :  { %147 = vmatprep.subr.mxu0 %v203_v1 }
   0x6   :  { %148 = vmatpush3.msra.mxu0 %v29_v3 }
   0x7   :  { %8 = vsyncpa [#allocation3], 0  ;;  %149 = vmatprep.subr.mxu0 %v203_v1  ;;  %v27_v5 = vld [vmem:[%s284_s1 + $0x58] sm:$0xff]  ;;  %v26_v6 = vld [vmem:[%s284_s1 + $0x50] sm:$0xff]  ;;  %s205_s21 = smov [#allocation2]   ;;  %vm109_vm1 = vcmask 254976  }
   0x8   :  { %150 = vmatpush3.msra.mxu0 %v28_v4  ;;  %v25_v7 = vld [vmem:[%s284_s1 + $0x48] sm:$0xff]  ;;  %v24_v8 = vld [vmem:[%s284_s1 + $0x40] sm:$0xff]  ;;  %v23_v9 = vld [vmem:[%s284_s1 + $0x38] sm:$0xff]  ;;  %s117_s22 = sshll.u32 %s205_s21, 4  ;;  %s118_s22 = int_to_ptr.vmem [resolvable:$true] %s117_s22 }
   0x9   :  { %151 = vmatprep.subr.mxu0 %v203_v1  ;;  %v22_v10 = vld [vmem:[%s284_s1 + $0x30] sm:$0xff]  ;;  %v21_v11 = vld [vmem:[%s284_s1 + $0x28] sm:$0xff]  ;;  %v20_v12 = vld [vmem:[%s284_s1 + $0x20] sm:$0xff]  ;;  %p186_p1 = scmp.lt.s32.totalorder %s118_s22, %s118_s22 }
   0xa   :  { %152 = vmatpush3.msra.mxu0 %v27_v5  ;;  %v19_v13 = vld [vmem:[%s284_s1 + $0x18] sm:$0xff]  ;;  %v18_v14 = vld [vmem:[%s284_s1 + $0x10] sm:$0xff]  ;;  %v17_v15 = vld [vmem:[%s284_s1 + $0x8] sm:$0xff] }
   0xb   :  { %153 = vmatprep.subr.mxu0 %v203_v1  ;;  %v16_v16 = vld [vmem:[%s284_s1] sm:$0xff]  ;;  %s181_s1 = scalar_lea.vmem %s118_s22, 32 }
   0xc   :  { %154 = vmatpush3.msra.mxu0 %v26_v6  ;;  %v15_v17 = vld [vmem:[%s283_s0] sm:$0x3]  ;;  %p182_p0 = scmp.ne.s32.totalorder %s118_s22, %s181_s1  ;;  %p187_p2 = scmp.lt.s32.totalorder %s181_s1, %s181_s1 }
   0xd   :  { %155 = vmatprep.subr.mxu0 %v203_v1  ;;  %v125_v18 = vld [vmem:[%s285_s2] ss:$0 sm:$0xff] }
   0xe   :  { %156 = vmatpush3.msra.mxu0 %v25_v7  ;;  %p188_p3 = por %p187_p2, %p186_p1 }
   0xf   :  { %157 = vmatprep.subr.mxu0 %v203_v1 }
  0x10   :  { %158 = vmatpush3.msra.mxu0 %v24_v8  ;;  %p189_p4 = pnand %p188_p3, %p182_p0 }
  0x11   :  { %159 = vmatprep.subr.mxu0 %v203_v1 }
  0x12   :  { %160 = vmatpush3.msra.mxu0 %v23_v9 }
  0x13   :  { %161 = vmatprep.subr.mxu0 %v203_v1 }
  0x14   :  { %162 = vmatpush3.msra.mxu0 %v22_v10 }
  0x15   :  { %163 = vmatprep.subr.mxu0 %v203_v1 }
  0x16   :  { %164 = vmatpush3.msra.mxu0 %v21_v11 }
  0x17   :  { %165 = vmatprep.subr.mxu0 %v203_v1 }
  0x18   :  { %166 = vmatpush3.msra.mxu0 %v20_v12 }
  0x19   :  { %167 = vmatprep.subr.mxu0 %v203_v1 }
  0x1a   :  { %168 = vmatpush3.msra.mxu0 %v19_v13 }
  0x1b   :  { %169 = vmatprep.subr.mxu0 %v203_v1 }
  0x1c   :  { %170 = vmatpush3.msra.mxu0 %v18_v14 }
  0x1d   :  { %171 = vmatprep.subr.mxu0 %v203_v1 }
  0x1e   :  { %172 = vmatpush3.msra.mxu0 %v17_v15 }
  0x1f   :  { %173 = vmatprep.subr.mxu0 %v203_v1 }
  0x20   :  { %174 = vmatpush3.msra.mxu0 %v16_v16 }
  0x21   :  { %176 = vmatmul.mubr.f32.vlgmr.msra.gmra.mxu0 %v15_v17 }
  0xe1   :  { %v105_v19 = vpop.f32.mrf.mxu0 }
  0xe2   :  { %v106_v20 = vadd.f32 %v125_v18, %v105_v19 }
  0xe3   :  { %v177_v21 = vpop.f32.mrf.mxu0 }
  0xe4   :  { %110 = vst.msk [vmem:[#allocation2] sm:$0x3] %vm109_vm1, %v106_v20 }
  0xe5   :  { %192 = shalt.err (!%p189_p4)
}
  0xe6   :  { %120 = dma.vmem_to_hbm [thread:$0]  %s118_s22, 32, %s286_s3, [#allocation3]  }
  0xe7   :  { %201 = dma.done.wait [#allocation3], 32  }
  0xe8   :  { %202 = vsyncadd [#allocation3], 4294967264 }
  0xe9   :  { %124 = vsyncpa [#allocation3], 1 }

</bundles_post_ra>
